<compile_context>
chip_gen: v7x
topology: tpu7x:2x2x1
jax: 0.10.0
libtpu: 0.0.40
codegen_flags: <defaults>
</compile_context>

<pallas_src>
import jax
import jax.numpy as jnp
from jax.experimental import pallas as pl
from jax.experimental.pallas import tpu as pltpu


def _vq_kernel(x_ref, emb_ref, embt_ref, e2_ref, q_ref, idx_ref):
    """One (batch, pixel-tile) step.

    x_ref:    (1, D, T) f32  input pixels (channels on sublanes, pixels on lanes)
    emb_ref:  (K, D)    f32  codebook (resident every step)
    embt_ref: (D, K)    f32  transposed codebook (resident)
    e2_ref:   (K, 1)    f32  per-code squared norms (precomputed, resident)
    q_ref:    (1, D, T) f32  quantized pixels
    idx_ref:  (1, 1, T) i32  nearest-code indices
    """
    x = x_ref[0]                  # (D, T)
    e = emb_ref[...]              # (K, D)
    et = embt_ref[...]            # (D, K)
    e2 = e2_ref[...]              # (K, 1)

    # argmin_k(||x||^2 + ||e_k||^2 - 2 x.e_k) == argmin_k(||e_k||^2 - 2 x.e_k)
    xe = jnp.dot(e, x, preferred_element_type=jnp.float32)       # (K, T)
    dist = e2 - 2.0 * xe                                          # (K, T)

    k = dist.shape[0]
    min_d = jnp.min(dist, axis=0, keepdims=True)                  # (1, T)
    k_iota = jax.lax.broadcasted_iota(jnp.int32, dist.shape, 0)   # (K, T)
    # first index achieving the minimum (matches torch.argmin tie-break)
    idx = jnp.min(jnp.where(dist <= min_d, k_iota, k), axis=0)    # (T,) int32

    enc = (k_iota == idx[None, :]).astype(jnp.float32)            # (K, T) one-hot
    q = jnp.dot(et, enc, preferred_element_type=jnp.float32)      # (D, T)

    q_ref[0] = q.astype(q_ref.dtype)
    idx_ref[...] = idx[None, None, :]


def _round_up(x, m):
    return -(-x // m) * m


def _vq_pallas(x_flat, embedding, *, max_tile_hw=2048):
    """x_flat: (B, D, HW) f32, embedding: (K, D) f32.

    Returns (quantized (B, D, HW) f32, indices (B, HW) int32).
    """
    B, D, HW = x_flat.shape
    K, _ = embedding.shape

    # Lane tile over the pixel axis: as large as feasible, multiple of 128 (or
    # the whole padded axis).  Pad the pixel axis so the grid divides evenly;
    # padded columns are sliced off below (no assert on divisibility).
    tile = min(max_tile_hw, _round_up(HW, 128))
    hw_pad = _round_up(HW, tile)
    if hw_pad != HW:
        x_flat = jnp.pad(x_flat, ((0, 0), (0, 0), (0, hw_pad - HW)))

    emb_t = embedding.T                                              # (D, K)
    e2 = jnp.sum(embedding * embedding, axis=1, keepdims=True)       # (K, 1)

    grid = (B, hw_pad // tile)

    q, idx = pl.pallas_call(
        _vq_kernel,
        out_shape=(
            jax.ShapeDtypeStruct((B, D, hw_pad), jnp.float32),
            jax.ShapeDtypeStruct((B, 1, hw_pad), jnp.int32),
        ),
        grid_spec=pltpu.PrefetchScalarGridSpec(
            num_scalar_prefetch=0,
            grid=grid,
            in_specs=[
                pl.BlockSpec((1, D, tile), lambda b, j: (b, 0, j)),
                pl.BlockSpec((K, D), lambda b, j: (0, 0)),
                pl.BlockSpec((D, K), lambda b, j: (0, 0)),
                pl.BlockSpec((K, 1), lambda b, j: (0, 0)),
            ],
            out_specs=[
                pl.BlockSpec((1, D, tile), lambda b, j: (b, 0, j)),
                pl.BlockSpec((1, 1, tile), lambda b, j: (b, 0, j)),
            ],
        ),
        compiler_params=pltpu.CompilerParams(
            dimension_semantics=("parallel", "parallel"),
        ),
    )(x_flat, embedding, emb_t, e2)

    return q[:, :, :HW], idx[:, 0, :HW]


def vector_quantizer_ema_forward(x_nchw, embedding, commitment_cost):
    """Eval-mode forward of VectorQuantizerEMA.

    x_nchw:    (B, C, H, W) f32, C == embedding_dim
    embedding: (K, C) f32 codebook
    Returns (codebook_loss, commitment_loss, quantized_nchw, perplexity, encodings)
    """
    B, C, H, W = x_nchw.shape
    K, D = embedding.shape
    assert D == C
    HW = H * W

    x_flat = x_nchw.reshape(B, D, HW)          # pure reshape, no transpose
    q_flat, idx = _vq_pallas(x_flat, embedding)
    quantized = q_flat.reshape(B, D, H, W)     # already NCHW

    # Losses (detach only affects gradients; forward values identical).
    diff2 = jnp.mean((quantized - x_nchw) ** 2)
    e_latent_loss = diff2
    commitment_loss = commitment_cost * e_latent_loss
    codebook_loss = diff2

    # Straight-through estimator (value-identical to `quantized` in forward).
    quantized_st = x_nchw + jax.lax.stop_gradient(quantized - x_nchw)

    # Encodings in NHWC-flat row order (b, h, w) — reconstructed from indices.
    idx_flat = idx.reshape(-1)                                   # (B*H*W,)
    encodings = jax.nn.one_hot(idx_flat, K, dtype=jnp.float32)   # (N, K)
    avg_probs = jnp.mean(encodings, axis=0)
    perplexity = jnp.exp(-jnp.sum(avg_probs * jnp.log(avg_probs + 1e-10)))

    return codebook_loss, commitment_loss, quantized_st, perplexity, encodings


if __name__ == "__main__":
    # Module hyperparameters (small, consistent with the torch module)
    num_embeddings = 16
    embedding_dim = 4
    commitment_cost = 0.25

    key = jax.random.PRNGKey(0)
    k_emb, k_x = jax.random.split(key)

    # Deterministic parameter init: embedding.weight.data.normal_()
    embedding = jax.random.normal(
        k_emb, (num_embeddings, embedding_dim), dtype=jnp.float32
    )
    # Input: NCHW, channels == embedding_dim
    x = jax.random.normal(k_x, (2, embedding_dim, 16, 16), dtype=jnp.float32)

    fwd = jax.jit(
        lambda x, e: vector_quantizer_ema_forward(x, e, commitment_cost)
    )
    codebook_loss, commitment_loss, quantized, perplexity, encodings = fwd(
        x, embedding
    )
    jax.block_until_ready(
        (codebook_loss, commitment_loss, quantized, perplexity, encodings)
    )

    # --- sanity checks against an exact pure-JAX reference ---
    B, C, H, W = x.shape
    N = B * H * W
    flat = jnp.transpose(x, (0, 2, 3, 1)).reshape(-1, embedding_dim)  # NHWC flat
    # Exact squared distances (no matmul precision ambiguity in the reference).
    dist_ref = jnp.sum((flat[:, None, :] - embedding[None, :, :]) ** 2, axis=-1)

    idx_kernel = jnp.argmax(encodings, axis=1)  # kernel's chosen codes
    # Tolerance-aware nearest-code check (robust to f32 near-ties).
    chosen_d = jnp.take_along_axis(dist_ref, idx_kernel[:, None], axis=1)[:, 0]
    best_d = jnp.min(dist_ref, axis=1)
    assert bool(jnp.all(chosen_d <= best_d + 1e-4)), "non-nearest code selected"

    # Quantized output (straight-through) must equal the selected codebook rows.
    q_expect = embedding[idx_kernel].reshape(B, H, W, embedding_dim)
    q_expect_nchw = jnp.transpose(q_expect, (0, 3, 1, 2))
    assert jnp.allclose(quantized, q_expect_nchw, atol=1e-5), "quantized mismatch"

    # Losses / perplexity consistent with the kernel's code assignment.
    inputs_nhwc = jnp.transpose(x, (0, 2, 3, 1))
    loss_ref = jnp.mean((q_expect - inputs_nhwc) ** 2)
    assert jnp.allclose(codebook_loss, loss_ref, rtol=1e-5, atol=1e-6)
    assert jnp.allclose(commitment_loss, commitment_cost * loss_ref,
                        rtol=1e-5, atol=1e-6)
    avg_ref = jnp.mean(jax.nn.one_hot(idx_kernel, num_embeddings,
                                      dtype=jnp.float32), axis=0)
    ppl_ref = jnp.exp(-jnp.sum(avg_ref * jnp.log(avg_ref + 1e-10)))
    assert jnp.allclose(perplexity, ppl_ref, rtol=1e-5, atol=1e-6)

    assert quantized.shape == x.shape
    assert encodings.shape == (N, num_embeddings)

    print("KERNEL_OK")
</pallas_src>

<mosaic_0001>
module attributes {stable_mosaic.version = 11 : i64} {
  func.func @_vq_kernel(%arg0: i32, %arg1: i32, %arg2: memref<1x4x256xf32, #tpu.memory_space<vmem>>, %arg3: memref<16x4xf32, #tpu.memory_space<vmem>>, %arg4: memref<4x16xf32, #tpu.memory_space<vmem>>, %arg5: memref<16x1xf32, #tpu.memory_space<vmem>>, %arg6: memref<1x4x256xf32, #tpu.memory_space<vmem>>, %arg7: memref<1x1x256xi32, #tpu.memory_space<vmem>>) attributes {dimension_semantics = [#tpu.dimension_semantics<parallel>, #tpu.dimension_semantics<parallel>], iteration_bounds = array<i64: 2, 1>, scalar_prefetch = 0 : i64, scratch_operands = 0 : i64, tpu.core_type = #tpu.core_type<tc>, window_params = [{transform_indices = @transform_0, window_bounds = array<i64: 1, 4, 256>}, {pipeline_mode = #tpu.pipeline_mode<synchronous>, transform_indices = @transform_1, window_bounds = array<i64: 16, 4>}, {pipeline_mode = #tpu.pipeline_mode<synchronous>, transform_indices = @transform_2, window_bounds = array<i64: 4, 16>}, {pipeline_mode = #tpu.pipeline_mode<synchronous>, transform_indices = @transform_3, window_bounds = array<i64: 16, 1>}, {transform_indices = @transform_4, window_bounds = array<i64: 1, 4, 256>}, {transform_indices = @transform_5, window_bounds = array<i64: 1, 1, 256>}]} {
    %c0 = arith.constant 0 : index
    %c0_0 = arith.constant 0 : index
    %c0_1 = arith.constant 0 : index
    %0 = vector.load %arg2[%c0, %c0_0, %c0_1] : memref<1x4x256xf32, #tpu.memory_space<vmem>>, vector<1x4x256xf32>
    %1 = vector.shape_cast %0 : vector<1x4x256xf32> to vector<4x256xf32>
    %c0_2 = arith.constant 0 : index
    %c0_3 = arith.constant 0 : index
    %2 = vector.load %arg3[%c0_2, %c0_3] : memref<16x4xf32, #tpu.memory_space<vmem>>, vector<16x4xf32>
    %c0_4 = arith.constant 0 : index
    %c0_5 = arith.constant 0 : index
    %3 = vector.load %arg4[%c0_4, %c0_5] : memref<4x16xf32, #tpu.memory_space<vmem>>, vector<4x16xf32>
    %c0_6 = arith.constant 0 : index
    %c0_7 = arith.constant 0 : index
    %4 = vector.load %arg5[%c0_6, %c0_7] : memref<16x1xf32, #tpu.memory_space<vmem>>, vector<16x1xf32>
    %cst = arith.constant dense<0.000000e+00> : vector<16x256xf32>
    %5 = tpu.matmul %2, %1, %cst {dimension_numbers = #tpu.dot_dimension_numbers<[1], [0], [0], [1], [0, 0, 1, 1], [], []>} : vector<16x4xf32>, vector<4x256xf32>, vector<16x256xf32> -> vector<16x256xf32>
    %cst_8 = arith.constant 2.000000e+00 : f32
    %6 = vector.broadcast %cst_8 : f32 to vector<16x256xf32>
    %7 = arith.mulf %6, %5 : vector<16x256xf32>
    %8 = vector.broadcast %4 : vector<16x1xf32> to vector<16x256xf32>
    %9 = arith.subf %8, %7 : vector<16x256xf32>
    %cst_9 = arith.constant dense<0x7F800000> : vector<256xf32>
    %10 = vector.multi_reduction <minimumf>, %9, %cst_9 [0] : vector<16x256xf32> to vector<256xf32>
    %11 = vector.shape_cast %10 : vector<256xf32> to vector<1x256xf32>
    %12 = tpu.iota {dimensions = array<i32: 0>} : vector<16x256xi32>
    %13 = vector.broadcast %11 : vector<1x256xf32> to vector<16x256xf32>
    %14 = arith.cmpf ole, %9, %13 : vector<16x256xf32>
    %c16_i32 = arith.constant 16 : i32
    %15 = vector.broadcast %c16_i32 : i32 to vector<16x256xi32>
    %16 = arith.select %14, %12, %15 : vector<16x256xi1>, vector<16x256xi32>
    %cst_10 = arith.constant dense<2147483647> : vector<256xi32>
    %17 = vector.multi_reduction <minsi>, %16, %cst_10 [0] : vector<16x256xi32> to vector<256xi32>
    %18 = vector.shape_cast %17 : vector<256xi32> to vector<1x256xi32>
    %19 = vector.broadcast %18 : vector<1x256xi32> to vector<16x256xi32>
    %20 = arith.cmpi eq, %12, %19 : vector<16x256xi32>
    %21 = arith.extui %20 : vector<16x256xi1> to vector<16x256xi32>
    %22 = arith.sitofp %21 : vector<16x256xi32> to vector<16x256xf32>
    %cst_11 = arith.constant dense<0.000000e+00> : vector<4x256xf32>
    %23 = tpu.matmul %3, %22, %cst_11 {dimension_numbers = #tpu.dot_dimension_numbers<[1], [0], [0], [1], [0, 0, 1, 1], [], []>} : vector<4x16xf32>, vector<16x256xf32>, vector<4x256xf32> -> vector<4x256xf32>
    %c0_12 = arith.constant 0 : index
    %c0_13 = arith.constant 0 : index
    %c0_14 = arith.constant 0 : index
    %24 = vector.load %arg6[%c0_12, %c0_13, %c0_14] : memref<1x4x256xf32, #tpu.memory_space<vmem>>, vector<1x4x256xf32>
    %25 = vector.shape_cast %24 : vector<1x4x256xf32> to vector<4x256xf32>
    %26 = vector.shape_cast %23 : vector<4x256xf32> to vector<1x4x256xf32>
    tpu.vector_store %arg6[%c0_12, %c0_13, %c0_14], %26 {strides = array<i32>} : memref<1x4x256xf32, #tpu.memory_space<vmem>>, vector<1x4x256xf32>,
    %27 = vector.shape_cast %17 : vector<256xi32> to vector<1x1x256xi32>
    %c0_15 = arith.constant 0 : index
    %c0_16 = arith.constant 0 : index
    %c0_17 = arith.constant 0 : index
    %28 = vector.load %arg7[%c0_15, %c0_16, %c0_17] : memref<1x1x256xi32, #tpu.memory_space<vmem>>, vector<1x1x256xi32>
    tpu.vector_store %arg7[%c0_15, %c0_16, %c0_17], %27 {strides = array<i32>} : memref<1x1x256xi32, #tpu.memory_space<vmem>>, vector<1x1x256xi32>,
    return
  }
  func.func @transform_0(%arg0: i32, %arg1: i32) -> (i32, i32, i32) {
    %c0_i32 = arith.constant 0 : i32
    %c0_i32_0 = arith.constant 0 : i32
    return %arg0, %c0_i32, %arg1 : i32, i32, i32
  }
  func.func @transform_1(%arg0: i32, %arg1: i32) -> (i32, i32) {
    %c0_i32 = arith.constant 0 : i32
    %c0_i32_0 = arith.constant 0 : i32
    %c0_i32_1 = arith.constant 0 : i32
    return %c0_i32, %c0_i32_0 : i32, i32
  }
  func.func @transform_2(%arg0: i32, %arg1: i32) -> (i32, i32) {
    %c0_i32 = arith.constant 0 : i32
    %c0_i32_0 = arith.constant 0 : i32
    %c0_i32_1 = arith.constant 0 : i32
    return %c0_i32, %c0_i32_0 : i32, i32
  }
  func.func @transform_3(%arg0: i32, %arg1: i32) -> (i32, i32) {
    %c0_i32 = arith.constant 0 : i32
    %c0_i32_0 = arith.constant 0 : i32
    %c0_i32_1 = arith.constant 0 : i32
    return %c0_i32, %c0_i32_0 : i32, i32
  }
  func.func @transform_4(%arg0: i32, %arg1: i32) -> (i32, i32, i32) {
    %c0_i32 = arith.constant 0 : i32
    %c0_i32_0 = arith.constant 0 : i32
    return %arg0, %c0_i32, %arg1 : i32, i32, i32
  }
  func.func @transform_5(%arg0: i32, %arg1: i32) -> (i32, i32, i32) {
    %c0_i32 = arith.constant 0 : i32
    %c0_i32_0 = arith.constant 0 : i32
    return %arg0, %c0_i32, %arg1 : i32, i32, i32
  }
}

</mosaic_0001>

<bundles_post_ra>
// kernel: _lambda_.1
= control target key start
LH: loop header
LB: loop body
LE: loop exit
PB: predicated region body
PF: predicated region fallthrough
CT: control target
= control target key end

     0   :  { %s810_s18 = smov 0   ;;  %s812_s19 = smov 0   ;;  %s869_s0 = inlined_call_operand.vmem [shape: f32[2,4,256], index: 0, kind: input, shape index: {}]   ;;  %s870_s1 = inlined_call_operand.vmem [shape: f32[16,4], index: 1, kind: input, shape index: {}]   ;;  %s871_s2 = inlined_call_operand.vmem [shape: f32[4,16], index: 2, kind: input, shape index: {}]   ;;  %s872_s3 = inlined_call_operand.vmem [shape: f32[16,1], index: 3, kind: input, shape index: {}]   ;;  %s873_s4 = inlined_call_operand.vmem [shape: f32[2,4,256], index: 4, kind: output, shape index: {0}]   ;;  %s874_s5 = inlined_call_operand.vmem [shape: s32[2,1,256], index: 5, kind: output, shape index: {1}]  }
   0x1   :  { %s814_s20 = smov 0  }
   0x2 LB: > { %s28_s21 = sadd.s32 1, %s770_s19  ;;  %p695_p0 = scmp.ge.s32.totalorder %s774_s20, 1  ;;  %s774_s20 = sphi %s814_s20, %s16_s20   ;;  %s770_s19 = sphi %s812_s19, %s876_s19   ;;  %s766_s18 = sphi %s810_s18, %s875_s18  }
   0x3   : > { %p30_p1 = scmp.ge.s32.totalorder %s28_s21, 2  ;;  %p213_p2 = scmp.lt.s32.totalorder %s774_s20, 3 }
   0x5   : > { %s878_s21 = smov (%p30_p1, %s28_s21), 0  ;;  %p214_p3 = pnand %p695_p0, %p213_p2 }
   0x6   : > { %p258_p4 = scmp.lt.s32.totalorder (!%p214_p3), %s766_s18, 1  ;;  %v776_v0 = vmov (!%p214_p3), 0.0   ;;  %v290_v1 = vld [vmem:[%s872_s3] sm:$0xff] (!%p214_p3)  ;;  %v777_v2 = vmov (!%p214_p3), 0   ;;  %v291_v3 = vld [vmem:[%s872_s3 + $0x8] sm:$0xff] (!%p214_p3)  ;;  %vm301_vm0 = vcmask (!%p214_p3), 1043456   ;;  %v415_v25 = vlaneseq (!%p214_p3) }
   0x7   : > { %217 = sbr.rel (%p214_p3) target bundleno = 495 (0x1ef), region = 36  ;;  %370 = vmatprep.mubr.f32.mxu0 (!%p214_p3), %v776_v0  ;;  %528 = vmatprep.mubr.f32.mxu1 (!%p214_p3), %v776_v0  ;;  %v287_v6 = vld [vmem:[%s870_s1] sm:$0xff] (!%p214_p3)  ;;  %vm294_vm1 = vcmask (!%p214_p3), 31744   ;;  %v288_v7 = vld [vmem:[%s870_s1 + $0x8] sm:$0xff] (!%p214_p3)  ;;  %v778_v48 = vmov (!%p214_p3), 1966171168  }
   0x8   : > { %750 = vset.pattern.permute.xlu0 (!%p214_p3), %v777_v2  ;;  %v416_v30 = vshrl.u32 (!%p214_p3), %v415_v25, 7  ;;  %v542_v49 = vunpack.c.l.s4 (!%p214_p3), %v778_v48  ;;  %v779_v62 = vmov (!%p214_p3), 1.0|1.0  }
   0x9   : > { %389 = vperm.xlu0 (!%p214_p3), %750, %v290_v1  }
   0xa   : > { %v417_v35 = vadd.s32 (!%p214_p3), 8, %v416_v30  ;;  %v543_v54 = vunpack.c.0.s8 (!%p214_p3), %v542_v49 }
   0xc   : > { %v546_v59 = vsub.s32 (!%p214_p3), %v543_v54, %v416_v30 }
   0xd   : > { %394 = vperm.xlu0 (!%p214_p3), %750, %v291_v3  }
   0xe   : > { %s880_s18 = smov (!%p258_p4, %s766_s18), 1 }
   0xf   : > { %s716_s24 = sshll.u32 %s880_s18, 3  ;;  %s700_s9 = sshll.u32 %s880_s18, 1 }
  0x10   : > { %s265_s29 = scalar_lea.vmem %s869_s0, %s716_s24  ;;  %s284_s12 = scalar_lea.vmem %s874_s5, %s700_s9 }
  0x11   : > { %v286_v4 = vld [vmem:[%s265_s29] sm:$0xff]  ;;  %s275_s17 = scalar_lea.vmem %s873_s4, %s716_s24 }
  0x12   : > { %v293_v5 = vcombine.high %v286_v4, %v286_v4 }
  0x14   : > { %701 = vmatprep.subr.msk.mxu0 %vm301_vm0, %v293_v5 }
  0x15   : > { %702 = vmatpush1.msk.msra.mxu0 %vm301_vm0, %v286_v4 }
  0x16   : > { %703 = vmatmul.mubr.msk.f32.vlgmr.msra.gmra.mrb[0].mxu0 %vm294_vm1, %v287_v6 }
  0x17   : > { %376 = vmatprep.mubr.f32.mxu0 %v776_v0  ;;  %v289_v0 = vld [vmem:[%s871_s2] sm:$0xf] }
  0x1a   : > { %704 = vmatmul.mubr.msk.f32.gmra.mrb[2].mxu0 %vm294_vm1, %v288_v7 }
  0x88   : > { %v390_v8 = vpop.permute.xlu0 %389 }
  0x8c   : > { %v395_v16 = vpop.permute.xlu0 %394 }
  0xe9   : > { %v372_v9 = vpop.f32.mrb[0].mxu0 }
  0xea   : > { %v374_v10 = vpop.f32.mrb[1].mxu0  ;;  %v383_v11 = vmul.f32 2.0, %v372_v9 }
  0xeb   : > { %v384_v12 = vmul.f32 2.0, %v374_v10 }
  0xec   : > { %v397_v18 = vsub.f32 %v390_v8, %v383_v11 }
  0xed   : > { %v378_v13 = vpop.f32.mrb[2].mxu0  ;;  %v398_v20 = vsub.f32 %v390_v8, %v384_v12 }
  0xee   : > { %v385_v14 = vmul.f32 2.0, %v378_v13  ;;  %v380_v15 = vpop.f32.mrb[3].mxu0 }
  0xef   : > { %v386_v17 = vmul.f32 2.0, %v380_v15 }
  0xf0   : > { %v399_v19 = vsub.f32 %v395_v16, %v385_v14 }
  0xf1   : > { %v400_v21 = vsub.f32 %v395_v16, %v386_v17 }
  0xf2   : > { %v401_v22 = vmin.f32 %v397_v18, %v399_v19 }
  0xf3   : > { %v408_v23 = vmin.f32 %v398_v20, %v400_v21 }
  0xf4   : > { %v402_v24 = vrot.slane %v401_v22, 4 }
  0xf5   : > { %v409_v26 = vrot.slane %v408_v23, 4 }
  0xf6   : > { %v403_v27 = vmin.f32 %v401_v22, %v402_v24 }
  0xf7   : > { %v410_v28 = vmin.f32 %v408_v23, %v409_v26 }
  0xf8   : > { %v404_v29 = vrot.slane %v403_v27, 2 }
  0xf9   : > { %v411_v31 = vrot.slane %v410_v28, 2 }
  0xfa   : > { %v405_v32 = vmin.f32 %v403_v27, %v404_v29 }
  0xfb   : > { %v412_v33 = vmin.f32 %v410_v28, %v411_v31 }
  0xfc   : > { %v406_v34 = vrot.slane %v405_v32, 1 }
  0xfd   : > { %v413_v36 = vrot.slane %v412_v33, 1 }
  0xfe   : > { %v407_v37 = vmin.f32 %v405_v32, %v406_v34 }
  0xff   : > { %v414_v38 = vmin.f32 %v412_v33, %v413_v36 }
 0x100   : > { %vm418_vm2 = vcmp.le.f32.partialorder %v397_v18, %v407_v37  ;;  %vm420_vm3 = vcmp.le.f32.partialorder %v399_v19, %v407_v37 }
 0x101   : > { %v422_v39 = vsel %vm418_vm2, %v416_v30, 16  ;;  %v424_v40 = vsel %vm420_vm3, %v417_v35, 16  ;;  %vm419_vm4 = vcmp.le.f32.partialorder %v398_v20, %v414_v38  ;;  %vm421_vm5 = vcmp.le.f32.partialorder %v400_v21, %v414_v38 }
 0x102   : > { %vm426_vm6 = vcmp.lt.s32.totalorder %v422_v39, %v424_v40  ;;  %v423_v41 = vsel %vm419_vm4, %v416_v30, 16  ;;  %v425_v42 = vsel %vm421_vm5, %v417_v35, 16  ;;  %vm557_vm4 = vcmp.lt.s32.totalorder %v415_v25, 256 }
 0x103   : > { %v427_v43 = vsel %vm426_vm6, %v422_v39, %v424_v40  ;;  %vm437_vm7 = vcmp.lt.s32.totalorder %v423_v41, %v425_v42  ;;  %vm460_vm5 = vcmask 130048  }
 0x104   : > { %v428_v44 = vrot.slane %v427_v43, 4  ;;  %v438_v45 = vsel %vm437_vm7, %v423_v41, %v425_v42 }
 0x105   : > { %v439_v46 = vrot.slane %v438_v45, 4 }
 0x106   : > { %vm429_vm8 = vcmp.lt.s32.totalorder %v427_v43, %v428_v44 }
 0x107   : > { %vm440_vm9 = vcmp.lt.s32.totalorder %v438_v45, %v439_v46  ;;  %v430_v47 = vsel %vm429_vm8, %v427_v43, %v428_v44 }
 0x108   : > { %v441_v50 = vsel %vm440_vm9, %v438_v45, %v439_v46  ;;  %v431_v51 = vrot.slane %v430_v47, 2 }
 0x109   : > { %v442_v52 = vrot.slane %v441_v50, 2 }
 0x10a   : > { %vm432_vm10 = vcmp.lt.s32.totalorder %v430_v47, %v431_v51 }
 0x10b   : > { %vm443_vm11 = vcmp.lt.s32.totalorder %v441_v50, %v442_v52  ;;  %v433_v53 = vsel %vm432_vm10, %v430_v47, %v431_v51 }
 0x10c   : > { %v444_v55 = vsel %vm443_vm11, %v441_v50, %v442_v52  ;;  %v434_v56 = vrot.slane %v433_v53, 1 }
 0x10d   : > { %v445_v57 = vrot.slane %v444_v55, 1 }
 0x10e   : > { %vm435_vm12 = vcmp.lt.s32.totalorder %v433_v53, %v434_v56 }
 0x10f   : > { %vm446_vm13 = vcmp.lt.s32.totalorder %v444_v55, %v445_v57  ;;  %v436_v58 = vsel %vm435_vm12, %v433_v53, %v434_v56 }
 0x110   : > { %v447_v60 = vsel %vm446_vm13, %v444_v55, %v445_v57  ;;  %vm448_vm14 = vcmp.eq.s32.totalorder %v416_v30, %v436_v58  ;;  %vm450_vm15 = vcmp.eq.s32.totalorder %v417_v35, %v436_v58 }
 0x111   : > { %vm449_vm0 = vcmp.eq.s32.totalorder %v416_v30, %v447_v60  ;;  %vm451_vm1 = vcmp.eq.s32.totalorder %v417_v35, %v447_v60  ;;  %v540_v61 = vcombine.low %v436_v58, %v447_v60  ;;  %vm720_vm3 = vmpackc.low %vm450_vm15, %vm448_vm14 }
 0x112   : > { %vm718_vm2 = vmpackc.low %vm451_vm1, %vm449_vm0 }
 0x113   : > { %719 = vmatprep.subr.msk.bf16.mxu1 %vm718_vm2, %v779_v62  ;;  %v547_v63 = vrot.slane %v540_v61, %v546_v59 }
 0x114   : > { %721 = vmatpush1.bf16.msk.msra.mxu1 %vm720_vm3, %v779_v62 }
 0x115   : > { %v554_v1 = vrot.slane %v547_v63, %v546_v59 }
 0x117   : > { %559 = vst.msk [vmem:[%s284_s12] sm:$0x3] %vm557_vm4, %v554_v1  ;;  %713 = vmatmul.mubr.msk.f32.vlgmr.msra.gmra.mrb[0].mxu1 %vm460_vm5, %v289_v0 }
 0x1ea   : > { %v530_v2 = vpop.f32.mrb[0].mxu1 }
 0x1eb   : > { %v532_v3 = vpop.f32.mrb[1].mxu1 }
 0x1ec   : > { %v537_v4 = vcombine.low %v530_v2, %v532_v3 }
 0x1ee   : > { %539 = vst [vmem:[%s275_s17] sm:$0xff] %v537_v4 }
 0x1ef PF: > { %s16_s20 = sadd.s32 1, %s774_s20   ;;  %s875_s18 = smov %s770_s19 }
 0x1f0   : > { %p13_p5 = scmp.ge.s32.totalorder %s16_s20, 4   ;;  %s876_s19 = smov %s878_s21 }
 0x1f2   :  { %15 = sbr.rel (!%p13_p5) target bundleno = 2 (0x2), region = 78 }

</bundles_post_ra>
